<compile_context>
chip_gen: v5e
topology: v5e:2x2
jax: 0.10.0
libtpu: 0.0.40
codegen_flags: <defaults>
</compile_context>

<pallas_src>
import jax
import jax.numpy as jnp
from jax.experimental import pallas as pl
from jax.experimental.pallas import tpu as pltpu

HIDDEN = 128          # per-branch hidden width (as in the PyTorch module)
FUSED = 2 * HIDDEN    # fused hidden width (state branch | action branch)
TAIL_ROWS = 8         # tail block rows: [b1, b2, w3, b3, 0, 0, 0, 0]


def _round_up(x, m):
    return (x + m - 1) // m * m


def _cdiv(a, b):
    return -(-a // b)


# --------------------------------------------------------------------------
# Kernel
# --------------------------------------------------------------------------
def _critic_kernel(xs_ref, xa_ref, w1s_ref, w1a_ref, w2_ref, tail_ref, q_ref):
    cdt = w2_ref.dtype                       # MXU compute dtype for layer 2

    tail = tail_ref[...]                     # (8, 256) f32, loaded once, sliced as a value
    b1 = tail[0:1, :]                        # (1, 256)  layer-1 bias  [b1s | b1a]
    b2 = tail[1:2, :]                        # (1, 256)  layer-2 bias  [b2s | b2a]
    w3 = tail[2:3, :]                        # (1, 256)  output row    [w3s | w3a]
    b3 = tail[3:4, 0:1]                      # (1, 1)    b3s + b3a

    s = xs_ref[...]                          # (TB, state_dim)  f32
    a = xa_ref[...]                          # (TB, action_dim) f32

    # Layer 1: two tiny-K dots; results are the two 128-lane halves of the
    # fused hidden vector (keeps the branches independent, as in the module).
    hs = jnp.dot(s, w1s_ref[...], preferred_element_type=jnp.float32)    # (TB, 128)
    ha = jnp.dot(a, w1a_ref[...], preferred_element_type=jnp.float32)    # (TB, 128)
    h = jnp.concatenate([hs, ha], axis=-1) + b1                          # (TB, 256)
    h = jnp.maximum(h, 0.0)

    # Layer 2: one fused block-diagonal 256x256 MXU dot (bf16 in, f32 acc).
    h = jnp.dot(h.astype(cdt), w2_ref[...], preferred_element_type=jnp.float32)
    h = jnp.maximum(h + b2, 0.0)

    # Final 256 -> 1 projection on the VPU/XLU (already qs + qa because w3
    # stacks both output heads), plus the combined output bias.
    q = jnp.sum(h * w3, axis=-1, keepdims=True) + b3                     # (TB, 1)
    q_ref[...] = q.astype(q_ref.dtype)


# --------------------------------------------------------------------------
# Wrapper
# --------------------------------------------------------------------------
def critic_forward(state, action, params, *, block_b=2048):
    """q = f_state(state) + f_action(action); returns (B, 1) float32."""
    w1s, w1a, w2, tail = params["w1s"], params["w1a"], params["w2"], params["tail"]
    b = state.shape[0]
    sd = state.shape[1]
    ad = action.shape[1]
    assert w1s.shape == (sd, HIDDEN) and w1a.shape == (ad, HIDDEN)

    state = state.astype(jnp.float32)
    action = action.astype(jnp.float32)

    # Batch tiling: round to 16 rows (bf16 sublane packing).  Large batches
    # use block_b-row tiles; medium batches are split into 2 tiles so both
    # v7x TensorCores get work.
    block_b = max(16, _round_up(block_b, 16))
    b_pad = _round_up(b, 16)
    if b_pad > block_b:
        n_tiles = _cdiv(b_pad, block_b)
    elif b_pad >= 512:
        n_tiles = 2
    else:
        n_tiles = 1
    tb = _round_up(_cdiv(b_pad, n_tiles), 16)
    b_pad = n_tiles * tb

    if b_pad != b:
        state = jnp.pad(state, ((0, b_pad - b), (0, 0)))
        action = jnp.pad(action, ((0, b_pad - b), (0, 0)))

    out = pl.pallas_call(
        _critic_kernel,
        out_shape=jax.ShapeDtypeStruct((b_pad, 1), jnp.float32),
        grid=(n_tiles,),
        in_specs=[
            pl.BlockSpec((tb, sd), lambda i: (i, 0)),            # state tile
            pl.BlockSpec((tb, ad), lambda i: (i, 0)),            # action tile
            pl.BlockSpec((sd, HIDDEN), lambda i: (0, 0)),        # w1s (resident)
            pl.BlockSpec((ad, HIDDEN), lambda i: (0, 0)),        # w1a (resident)
            pl.BlockSpec((FUSED, FUSED), lambda i: (0, 0)),      # W2 block-diag (resident)
            pl.BlockSpec((TAIL_ROWS, FUSED), lambda i: (0, 0)),  # tail rows (resident)
        ],
        out_specs=pl.BlockSpec((tb, 1), lambda i: (i, 0)),
        compiler_params=pltpu.CompilerParams(
            dimension_semantics=("parallel",),
            vmem_limit_bytes=32 * 1024 * 1024),
    )(state, action, w1s, w1a, w2, tail)
    return out[:b]


# --------------------------------------------------------------------------
# Parameters
# --------------------------------------------------------------------------
def init_params(key, state_dim, action_dim):
    """Raw per-layer params, PyTorch-Linear-style init, weights stored (in, out)."""
    def linear(k, fan_in, fan_out):
        kw, kb = jax.random.split(k)
        bound = 1.0 / (fan_in ** 0.5)
        w = jax.random.uniform(kw, (fan_in, fan_out), jnp.float32, -bound, bound)
        b = jax.random.uniform(kb, (1, fan_out), jnp.float32, -bound, bound)
        return w, b

    keys = jax.random.split(key, 6)
    w1s, b1s = linear(keys[0], state_dim, HIDDEN)
    w2s, b2s = linear(keys[1], HIDDEN, HIDDEN)
    w3s, b3s = linear(keys[2], HIDDEN, 1)
    w1a, b1a = linear(keys[3], action_dim, HIDDEN)
    w2a, b2a = linear(keys[4], HIDDEN, HIDDEN)
    w3a, b3a = linear(keys[5], HIDDEN, 1)
    return dict(w1s=w1s, b1s=b1s, w2s=w2s, b2s=b2s, w3s=w3s, b3s=b3s,
                w1a=w1a, b1a=b1a, w2a=w2a, b2a=b2a, w3a=w3a, b3a=b3a)


def pack_params(p, dtype=jnp.bfloat16):
    """Kernel-ready params: f32 layer-1 weights, block-diag W2 (dtype), f32 tail."""
    w2 = jnp.zeros((FUSED, FUSED), jnp.float32)
    w2 = w2.at[:HIDDEN, :HIDDEN].set(p["w2s"])
    w2 = w2.at[HIDDEN:, HIDDEN:].set(p["w2a"])

    tail = jnp.zeros((TAIL_ROWS, FUSED), jnp.float32)
    tail = tail.at[0, :HIDDEN].set(p["b1s"][0]).at[0, HIDDEN:].set(p["b1a"][0])
    tail = tail.at[1, :HIDDEN].set(p["b2s"][0]).at[1, HIDDEN:].set(p["b2a"][0])
    tail = tail.at[2, :HIDDEN].set(p["w3s"][:, 0]).at[2, HIDDEN:].set(p["w3a"][:, 0])
    tail = tail.at[3, :].set(p["b3s"][0, 0] + p["b3a"][0, 0])

    return dict(w1s=p["w1s"].astype(jnp.float32),
                w1a=p["w1a"].astype(jnp.float32),
                w2=w2.astype(dtype),     # bf16 on the MXU (keep bf16 on v5e too)
                tail=tail)               # f32: biases / w3 / b3 added in f32


# --------------------------------------------------------------------------
# References
# --------------------------------------------------------------------------
def critic_reference_f32(state, action, p):
    """Module-faithful full-precision reference (PyTorch forward semantics)."""
    hs = jax.nn.relu(state @ p["w1s"] + p["b1s"])
    hs = jax.nn.relu(hs @ p["w2s"] + p["b2s"])
    qs = hs @ p["w3s"] + p["b3s"]
    ha = jax.nn.relu(action @ p["w1a"] + p["b1a"])
    ha = jax.nn.relu(ha @ p["w2a"] + p["b2a"])
    qa = ha @ p["w3a"] + p["b3a"]
    return qs + qa


def critic_reference_packed(state, action, params):
    """Pure-JAX reference mirroring the kernel's packing and dtype casts."""
    hi = jax.lax.Precision.HIGHEST
    tail = params["tail"]
    b1, b2, w3, b3 = tail[0], tail[1], tail[2], tail[3, 0]
    hs = jnp.dot(state.astype(jnp.float32), params["w1s"], precision=hi)
    ha = jnp.dot(action.astype(jnp.float32), params["w1a"], precision=hi)
    h = jax.nn.relu(jnp.concatenate([hs, ha], axis=-1) + b1)
    h = h.astype(params["w2"].dtype).astype(jnp.float32)       # mirror in-kernel cast
    h = jax.nn.relu(jnp.dot(h, params["w2"].astype(jnp.float32), precision=hi) + b2)
    return (h * w3).sum(axis=-1, keepdims=True) + b3


# --------------------------------------------------------------------------
if __name__ == "__main__":
    key = jax.random.PRNGKey(0)
    k_param, k_state, k_action = jax.random.split(key, 3)

    batch, state_dim, action_dim = 2, 16, 4
    raw = init_params(k_param, state_dim, action_dim)
    packed = pack_params(raw, dtype=jnp.bfloat16)

    state = jax.random.normal(k_state, (batch, state_dim), jnp.float32)
    action = jax.random.normal(k_action, (batch, action_dim), jnp.float32)

    q = critic_forward(state, action, packed)
    jax.block_until_ready(q)
    assert q.shape == (batch, 1)

    # Check vs. a reference that mirrors the packed / bf16 computation.
    q_packed_ref = critic_reference_packed(state, action, packed)
    assert jnp.allclose(q, q_packed_ref, atol=1e-2, rtol=1e-2), (q, q_packed_ref)

    # Sanity check vs. the full-f32 PyTorch-semantics reference (bf16 W2).
    q_f32_ref = critic_reference_f32(state, action, raw)
    assert jnp.allclose(q, q_f32_ref, atol=6e-2, rtol=6e-2), (q, q_f32_ref)

    print("KERNEL_OK")
</pallas_src>

<mosaic_0001>
module attributes {stable_mosaic.version = 11 : i64} {
  func.func @_critic_kernel(%arg0: i32, %arg1: memref<16x16xf32, #tpu.memory_space<vmem>>, %arg2: memref<16x4xf32, #tpu.memory_space<vmem>>, %arg3: memref<16x128xf32, #tpu.memory_space<vmem>>, %arg4: memref<4x128xf32, #tpu.memory_space<vmem>>, %arg5: memref<256x256xbf16, #tpu.memory_space<vmem>>, %arg6: memref<8x256xf32, #tpu.memory_space<vmem>>, %arg7: memref<16x1xf32, #tpu.memory_space<vmem>>) attributes {dimension_semantics = [#tpu.dimension_semantics<parallel>], iteration_bounds = array<i64: 1>, scalar_prefetch = 0 : i64, scratch_operands = 0 : i64, tpu.core_type = #tpu.core_type<tc>, window_params = [{transform_indices = @transform_0, window_bounds = array<i64: 16, 16>}, {transform_indices = @transform_1, window_bounds = array<i64: 16, 4>}, {pipeline_mode = #tpu.pipeline_mode<synchronous>, transform_indices = @transform_2, window_bounds = array<i64: 16, 128>}, {pipeline_mode = #tpu.pipeline_mode<synchronous>, transform_indices = @transform_3, window_bounds = array<i64: 4, 128>}, {pipeline_mode = #tpu.pipeline_mode<synchronous>, transform_indices = @transform_4, window_bounds = array<i64: 256, 256>}, {pipeline_mode = #tpu.pipeline_mode<synchronous>, transform_indices = @transform_5, window_bounds = array<i64: 8, 256>}, {transform_indices = @transform_6, window_bounds = array<i64: 16, 1>}]} {
    %c0 = arith.constant 0 : index
    %c0_0 = arith.constant 0 : index
    %0 = vector.load %arg6[%c0, %c0_0] : memref<8x256xf32, #tpu.memory_space<vmem>>, vector<8x256xf32>
    %1 = vector.extract_strided_slice %0 {offsets = [0, 0], sizes = [1, 256], strides = [1, 1]} : vector<8x256xf32> to vector<1x256xf32>
    %2 = vector.extract_strided_slice %0 {offsets = [1, 0], sizes = [1, 256], strides = [1, 1]} : vector<8x256xf32> to vector<1x256xf32>
    %3 = vector.extract_strided_slice %0 {offsets = [2, 0], sizes = [1, 256], strides = [1, 1]} : vector<8x256xf32> to vector<1x256xf32>
    %4 = vector.extract_strided_slice %0 {offsets = [3, 0], sizes = [1, 1], strides = [1, 1]} : vector<8x256xf32> to vector<1x1xf32>
    %c0_1 = arith.constant 0 : index
    %c0_2 = arith.constant 0 : index
    %5 = vector.load %arg1[%c0_1, %c0_2] : memref<16x16xf32, #tpu.memory_space<vmem>>, vector<16x16xf32>
    %c0_3 = arith.constant 0 : index
    %c0_4 = arith.constant 0 : index
    %6 = vector.load %arg2[%c0_3, %c0_4] : memref<16x4xf32, #tpu.memory_space<vmem>>, vector<16x4xf32>
    %c0_5 = arith.constant 0 : index
    %c0_6 = arith.constant 0 : index
    %7 = vector.load %arg3[%c0_5, %c0_6] : memref<16x128xf32, #tpu.memory_space<vmem>>, vector<16x128xf32>
    %cst = arith.constant dense<0.000000e+00> : vector<16x128xf32>
    %8 = tpu.matmul %5, %7, %cst {dimension_numbers = #tpu.dot_dimension_numbers<[1], [0], [0], [1], [0, 0, 1, 1], [], []>} : vector<16x16xf32>, vector<16x128xf32>, vector<16x128xf32> -> vector<16x128xf32>
    %c0_7 = arith.constant 0 : index
    %c0_8 = arith.constant 0 : index
    %9 = vector.load %arg4[%c0_7, %c0_8] : memref<4x128xf32, #tpu.memory_space<vmem>>, vector<4x128xf32>
    %cst_9 = arith.constant dense<0.000000e+00> : vector<16x128xf32>
    %10 = tpu.matmul %6, %9, %cst_9 {dimension_numbers = #tpu.dot_dimension_numbers<[1], [0], [0], [1], [0, 0, 1, 1], [], []>} : vector<16x4xf32>, vector<4x128xf32>, vector<16x128xf32> -> vector<16x128xf32>
    %11 = tpu.concatenate %8, %10 in 1 : vector<16x128xf32>, vector<16x128xf32> -> vector<16x256xf32>
    %12 = vector.broadcast %1 : vector<1x256xf32> to vector<16x256xf32>
    %13 = arith.addf %11, %12 : vector<16x256xf32>
    %cst_10 = arith.constant 0.000000e+00 : f32
    %14 = vector.broadcast %cst_10 : f32 to vector<16x256xf32>
    %15 = arith.maximumf %13, %14 : vector<16x256xf32>
    %16 = arith.truncf %15 : vector<16x256xf32> to vector<16x256xbf16>
    %c0_11 = arith.constant 0 : index
    %c0_12 = arith.constant 0 : index
    %17 = vector.load %arg5[%c0_11, %c0_12] : memref<256x256xbf16, #tpu.memory_space<vmem>>, vector<256x256xbf16>
    %cst_13 = arith.constant dense<0.000000e+00> : vector<16x256xf32>
    %18 = tpu.matmul %16, %17, %cst_13 {dimension_numbers = #tpu.dot_dimension_numbers<[1], [0], [0], [1], [0, 0, 1, 1], [], []>} : vector<16x256xbf16>, vector<256x256xbf16>, vector<16x256xf32> -> vector<16x256xf32>
    %19 = vector.broadcast %2 : vector<1x256xf32> to vector<16x256xf32>
    %20 = arith.addf %18, %19 : vector<16x256xf32>
    %cst_14 = arith.constant 0.000000e+00 : f32
    %21 = vector.broadcast %cst_14 : f32 to vector<16x256xf32>
    %22 = arith.maximumf %20, %21 : vector<16x256xf32>
    %23 = vector.broadcast %3 : vector<1x256xf32> to vector<16x256xf32>
    %24 = arith.mulf %22, %23 : vector<16x256xf32>
    %cst_15 = arith.constant dense<0.000000e+00> : vector<16xf32>
    %25 = vector.multi_reduction <add>, %24, %cst_15 [1] : vector<16x256xf32> to vector<16xf32>
    %26 = vector.shape_cast %25 : vector<16xf32> to vector<16x1xf32>
    %27 = vector.broadcast %4 : vector<1x1xf32> to vector<16x1xf32>
    %28 = arith.addf %26, %27 : vector<16x1xf32>
    %c0_16 = arith.constant 0 : index
    %c0_17 = arith.constant 0 : index
    %29 = vector.load %arg7[%c0_16, %c0_17] : memref<16x1xf32, #tpu.memory_space<vmem>>, vector<16x1xf32>
    tpu.vector_store %arg7[%c0_16, %c0_17], %28 {strides = array<i32>} : memref<16x1xf32, #tpu.memory_space<vmem>>, vector<16x1xf32>,
    return
  }
  func.func @transform_0(%arg0: i32) -> (i32, i32) {
    %c0_i32 = arith.constant 0 : i32
    %c0_i32_0 = arith.constant 0 : i32
    return %arg0, %c0_i32 : i32, i32
  }
  func.func @transform_1(%arg0: i32) -> (i32, i32) {
    %c0_i32 = arith.constant 0 : i32
    %c0_i32_0 = arith.constant 0 : i32
    return %arg0, %c0_i32 : i32, i32
  }
  func.func @transform_2(%arg0: i32) -> (i32, i32) {
    %c0_i32 = arith.constant 0 : i32
    %c0_i32_0 = arith.constant 0 : i32
    %c0_i32_1 = arith.constant 0 : i32
    return %c0_i32, %c0_i32_0 : i32, i32
  }
  func.func @transform_3(%arg0: i32) -> (i32, i32) {
    %c0_i32 = arith.constant 0 : i32
    %c0_i32_0 = arith.constant 0 : i32
    %c0_i32_1 = arith.constant 0 : i32
    return %c0_i32, %c0_i32_0 : i32, i32
  }
  func.func @transform_4(%arg0: i32) -> (i32, i32) {
    %c0_i32 = arith.constant 0 : i32
    %c0_i32_0 = arith.constant 0 : i32
    %c0_i32_1 = arith.constant 0 : i32
    return %c0_i32, %c0_i32_0 : i32, i32
  }
  func.func @transform_5(%arg0: i32) -> (i32, i32) {
    %c0_i32 = arith.constant 0 : i32
    %c0_i32_0 = arith.constant 0 : i32
    %c0_i32_1 = arith.constant 0 : i32
    return %c0_i32, %c0_i32_0 : i32, i32
  }
  func.func @transform_6(%arg0: i32) -> (i32, i32) {
    %c0_i32 = arith.constant 0 : i32
    %c0_i32_0 = arith.constant 0 : i32
    return %arg0, %c0_i32 : i32, i32
  }
}

</mosaic_0001>

<bundles_post_ra>
// kernel: tpu_custom_call.1
= control target key start
LH: loop header
LB: loop body
LE: loop exit
PB: predicated region body
PF: predicated region fallthrough
CT: control target
= control target key end

     0   :  { %11 = vsyncpa [#allocation3], 0  ;;  %s751_s0 = inlined_call_operand.vmem [shape: f32[16,16], index: 0, kind: input, shape index: {}]   ;;  %s752_s1 = inlined_call_operand.vmem [shape: f32[16,4], index: 1, kind: input, shape index: {}]   ;;  %s753_s2 = inlined_call_operand.hbm [shape: f32[16,128], index: 2, kind: input, shape index: {}]   ;;  %s754_s3 = inlined_call_operand.vmem [shape: f32[4,128], index: 3, kind: input, shape index: {}]   ;;  %s755_s4 = inlined_call_operand.hbm [shape: bf16[256,256], index: 4, kind: input, shape index: {}]   ;;  %s756_s5 = inlined_call_operand.hbm [shape: f32[8,256], index: 5, kind: input, shape index: {}]   ;;  %s757_s6 = inlined_call_operand.vmem [shape: f32[16,1], index: 6, kind: output, shape index: {}]  }
   0x1   :  { %12 = vsyncpa [#allocation5], 0  ;;  %s36_s23 = sshll.u32 %s755_s4, 4  ;;  %s677_s24 = smov [#allocation4]   ;;  %s37_s23 = int_to_ptr.hbm [resolvable:$true] %s36_s23 }
   0x2   :  { %s38_s25 = sshll.u32 %s677_s24, 4  ;;  %s21_s28 = sshll.u32 %s753_s2, 4  ;;  %s39_s25 = int_to_ptr.vmem [resolvable:$true] %s38_s25  ;;  %s22_s28 = int_to_ptr.hbm [resolvable:$true] %s21_s28 }
   0x3   :  { %s678_s29 = smov 128   ;;  %s679_s30 = smov 8  }
   0x4   :  { %44 = dma.hbm_to_vmem [thread:$0]  %s37_s23, 4096, %s39_s25, [#allocation5], %s678_s29, %s678_s29, %s679_s30  }
   0x5   :  { %s680_s7 = smov [#allocation2]   ;;  %s50_s11 = sshll.u32 %s756_s5, 4  ;;  %s51_s11 = int_to_ptr.hbm [resolvable:$true] %s50_s11 }
   0x6   :  { %s23_s8 = sshll.u32 %s680_s7, 4  ;;  %s681_s4 = smov [#allocation6]   ;;  %s24_s8 = int_to_ptr.vmem [resolvable:$true] %s23_s8 }
   0x7   :  { %29 = dma.hbm_to_vmem [thread:$0]  %s22_s28, 256, %s24_s8, [#allocation3], %s678_s29, %s678_s29, %s679_s30  }
   0x8   :  { %s52_s12 = sshll.u32 %s681_s4, 4  ;;  %s53_s12 = int_to_ptr.vmem [resolvable:$true] %s52_s12 }
   0x9   :  { %55 = dma.hbm_to_vmem [thread:$0]  %s51_s11, 256, %s53_s12, [#allocation5]  }
   0xa   :  { %673 = dma.done.wait [#allocation3], 256  }
   0xb   :  { %674 = vsyncadd [#allocation3], 4294967040 }
   0xc   :  { %675 = dma.done.wait [#allocation5], 4352  }
   0xd   :  { %676 = vsyncadd [#allocation5], 4294962944  ;;  %vm114_vm0 = vcmask 1043456   ;;  %vm107_vm1 = vcmask 31744   ;;  %v75_v0 = vld [vmem:[#allocation2 + $0x8] sm:$0xff]  ;;  %v72_v2 = vld [vmem:[%s752_s1] sm:$0xff] }
   0xe   :  { %v106_v1 = vld [vmem:[%s754_s3] sm:$0xf]  ;;  %97 = vmatpush.msra.mxu0 %v75_v0  ;;  %vm76_vm2 = vcmask 130048   ;;  %v595_v6 = vld [vmem:[#allocation4 + $0xf4] sm:$0xf0]  ;;  %vm422_vm3 = vcmask 7168  }
   0xf   :  { %433 = vmatpush.msk.msra.mxu1 %vm114_vm0, %v106_v1  ;;  %v74_v3 = vld [vmem:[#allocation2] sm:$0xff]  ;;  %v560_v9 = vld [vmem:[#allocation4 + $0xf8] sm:$0xf0]  ;;  %v579_v12 = vld [vmem:[#allocation4 + $0x74] sm:$0xf0] }
  0x10   :  { %v70_v4 = vld [vmem:[%s751_s0] sm:$0xff]  ;;  %434 = vmatmul.msk.f32.vlgmr.msra.gmra.mxu1 %vm107_vm1, %v72_v2  ;;  %98 = vmatpush.msra.mxu0 %v74_v3  ;;  %v496_v14 = vld [vmem:[#allocation4 + $0x78] sm:$0xf0]  ;;  %v550_v18 = vld [vmem:[#allocation4 + $0xe0] sm:$0xf] }
  0x11   :  { %v558_v5 = vld [vmem:[#allocation4 + $0xf0] sm:$0xf]  ;;  %v594_v8 = vld [vmem:[#allocation4 + $0xf4] sm:$0xf]  ;;  %431 = vmatmul.msk.f32.vlgmr.msra.gmra.mxu0 %vm76_vm2, %v70_v4  ;;  %v73_v15 = vld [vmem:[%s752_s1 + $0x8] sm:$0xff] }
  0x12   :  { %v559_v7 = vor.u32 %v595_v6, %v558_v5  ;;  %v494_v10 = vld [vmem:[#allocation4 + $0x70] sm:$0xf]  ;;  %v563_v11 = vor.u32 %v594_v8, %v560_v9  ;;  %v578_v13 = vld [vmem:[#allocation4 + $0x74] sm:$0xf]  ;;  %v593_v19 = vld [vmem:[#allocation4 + $0xe4] sm:$0xf0] }
  0x13   :  { %v495_v16 = vor.u32 %v579_v12, %v494_v10  ;;  %v499_v17 = vor.u32 %v578_v13, %v496_v14  ;;  %v592_v20 = vld [vmem:[#allocation4 + $0xe4] sm:$0xf]  ;;  %v551_v21 = vor.u32 %v593_v19, %v550_v18  ;;  %v552_v22 = vld [vmem:[#allocation4 + $0xe8] sm:$0xf0]  ;;  %v486_v23 = vld [vmem:[#allocation4 + $0x60] sm:$0xf] }
  0x14   :  { %361 = vmatpush.bf16.msra.mxu3 %v559_v7  ;;  %389 = vmatpush.bf16.msrb.mxu0 %v563_v11  ;;  %v577_v24 = vld [vmem:[#allocation4 + $0x64] sm:$0xf0]  ;;  %v71_v25 = vld [vmem:[%s751_s0 + $0x8] sm:$0xff]  ;;  %v555_v26 = vor.u32 %v592_v20, %v552_v22  ;;  %v576_v28 = vld [vmem:[#allocation4 + $0x64] sm:$0xf] }
  0x15   :  { %347 = vmatpush.bf16.msra.mxu2 %v495_v16  ;;  %375 = vmatpush.bf16.msrb.mxu1 %v499_v17  ;;  %v487_v27 = vor.u32 %v577_v24, %v486_v23  ;;  %v488_v29 = vld [vmem:[#allocation4 + $0x68] sm:$0xf0]  ;;  %v542_v30 = vld [vmem:[#allocation4 + $0xd0] sm:$0xf]  ;;  %v591_v32 = vld [vmem:[#allocation4 + $0xd4] sm:$0xf0] }
  0x16   :  { %v491_v31 = vor.u32 %v576_v28, %v488_v29  ;;  %v590_v33 = vld [vmem:[#allocation4 + $0xd4] sm:$0xf]  ;;  %v544_v34 = vld [vmem:[#allocation4 + $0xd8] sm:$0xf0]  ;;  %v543_v35 = vor.u32 %v591_v32, %v542_v30  ;;  %v478_v36 = vld [vmem:[#allocation4 + $0x50] sm:$0xf] }
  0x17   :  { %v575_v37 = vld [vmem:[#allocation4 + $0x54] sm:$0xf0]  ;;  %v574_v38 = vld [vmem:[#allocation4 + $0x54] sm:$0xf]  ;;  %v547_v39 = vor.u32 %v590_v33, %v544_v34  ;;  %v480_v40 = vld [vmem:[#allocation4 + $0x58] sm:$0xf0] }
  0x18   :  { %362 = vmatpush.bf16.msra.mxu3 %v551_v21  ;;  %435 = vmatmul.msk.f32.gmra.mxu1 %vm107_vm1, %v73_v15  ;;  %v534_v41 = vld [vmem:[#allocation4 + $0xc0] sm:$0xf]  ;;  %v589_v42 = vld [vmem:[#allocation4 + $0xc4] sm:$0xf0]  ;;  %v479_v43 = vor.u32 %v575_v37, %v478_v36  ;;  %v483_v44 = vor.u32 %v574_v38, %v480_v40  ;;  %v588_v45 = vld [vmem:[#allocation4 + $0xc4] sm:$0xf] }
  0x19   :  { %390 = vmatpush.bf16.msrb.mxu0 %v555_v26  ;;  %348 = vmatpush.bf16.msra.mxu2 %v487_v27  ;;  %v536_v46 = vld [vmem:[#allocation4 + $0xc8] sm:$0xf0]  ;;  %v470_v47 = vld [vmem:[#allocation4 + $0x40] sm:$0xf]  ;;  %v573_v48 = vld [vmem:[#allocation4 + $0x44] sm:$0xf0]  ;;  %v535_v51 = vor.u32 %v589_v42, %v534_v41 }
  0x1a   :  { %376 = vmatpush.bf16.msrb.mxu1 %v491_v31  ;;  %432 = vmatmul.msk.f32.gmra.mxu0 %vm76_vm2, %v71_v25  ;;  %v572_v49 = vld [vmem:[#allocation4 + $0x44] sm:$0xf]  ;;  %v472_v50 = vld [vmem:[#allocation4 + $0x48] sm:$0xf0]  ;;  %v539_v52 = vor.u32 %v588_v45, %v536_v46  ;;  %v471_v53 = vor.u32 %v573_v48, %v470_v47  ;;  %v526_v55 = vld [vmem:[#allocation4 + $0xb0] sm:$0xf] }
  0x1b   :  { %v475_v54 = vor.u32 %v572_v49, %v472_v50  ;;  %v587_v56 = vld [vmem:[#allocation4 + $0xb4] sm:$0xf0]  ;;  %v586_v57 = vld [vmem:[#allocation4 + $0xb4] sm:$0xf]  ;;  %v528_v59 = vld [vmem:[#allocation4 + $0xb8] sm:$0xf0] }
  0x1c   :  { %363 = vmatpush.bf16.msra.mxu3 %v543_v35  ;;  %v527_v58 = vor.u32 %v587_v56, %v526_v55  ;;  %v531_v60 = vor.u32 %v586_v57, %v528_v59  ;;  %v462_v61 = vld [vmem:[#allocation4 + $0x30] sm:$0xf]  ;;  %v571_v62 = vld [vmem:[#allocation4 + $0x34] sm:$0xf0]  ;;  %v570_v63 = vld [vmem:[#allocation4 + $0x34] sm:$0xf] }
  0x1d   :  { %391 = vmatpush.bf16.msrb.mxu0 %v547_v39  ;;  %349 = vmatpush.bf16.msra.mxu2 %v479_v43  ;;  %v463_v0 = vor.u32 %v571_v62, %v462_v61  ;;  %v464_v1 = vld [vmem:[#allocation4 + $0x38] sm:$0xf0]  ;;  %v518_v3 = vld [vmem:[#allocation4 + $0xa0] sm:$0xf]  ;;  %v585_v4 = vld [vmem:[#allocation4 + $0xa4] sm:$0xf0] }
  0x1e   :  { %377 = vmatpush.bf16.msrb.mxu1 %v483_v44  ;;  %v467_v2 = vor.u32 %v570_v63, %v464_v1  ;;  %v519_v5 = vor.u32 %v585_v4, %v518_v3  ;;  %v584_v6 = vld [vmem:[#allocation4 + $0xa4] sm:$0xf]  ;;  %v520_v7 = vld [vmem:[#allocation4 + $0xa8] sm:$0xf0]  ;;  %v454_v9 = vld [vmem:[#allocation4 + $0x20] sm:$0xf] }
  0x1f   :  { %v523_v8 = vor.u32 %v584_v6, %v520_v7  ;;  %v569_v10 = vld [vmem:[#allocation4 + $0x24] sm:$0xf0]  ;;  %v568_v11 = vld [vmem:[#allocation4 + $0x24] sm:$0xf]  ;;  %v456_v13 = vld [vmem:[#allocation4 + $0x28] sm:$0xf0] }
  0x20   :  { %364 = vmatpush.bf16.msra.mxu3 %v535_v51  ;;  %v455_v12 = vor.u32 %v569_v10, %v454_v9  ;;  %v459_v14 = vor.u32 %v568_v11, %v456_v13  ;;  %v510_v15 = vld [vmem:[#allocation4 + $0x90] sm:$0xf]  ;;  %v583_v16 = vld [vmem:[#allocation4 + $0x94] sm:$0xf0]  ;;  %v582_v17 = vld [vmem:[#allocation4 + $0x94] sm:$0xf] }
  0x21   :  { %392 = vmatpush.bf16.msrb.mxu0 %v539_v52  ;;  %350 = vmatpush.bf16.msra.mxu2 %v471_v53  ;;  %v511_v18 = vor.u32 %v583_v16, %v510_v15  ;;  %v512_v19 = vld [vmem:[#allocation4 + $0x98] sm:$0xf0]  ;;  %v446_v21 = vld [vmem:[#allocation4 + $0x10] sm:$0xf]  ;;  %v567_v22 = vld [vmem:[#allocation4 + $0x14] sm:$0xf0] }
  0x22   :  { %378 = vmatpush.bf16.msrb.mxu1 %v475_v54  ;;  %v515_v20 = vor.u32 %v582_v17, %v512_v19  ;;  %v566_v23 = vld [vmem:[#allocation4 + $0x14] sm:$0xf]  ;;  %v447_v24 = vor.u32 %v567_v22, %v446_v21  ;;  %v448_v25 = vld [vmem:[#allocation4 + $0x18] sm:$0xf0]  ;;  %v502_v27 = vld [vmem:[#allocation4 + $0x80] sm:$0xf] }
  0x23   :  { %v451_v26 = vor.u32 %v566_v23, %v448_v25  ;;  %v581_v28 = vld [vmem:[#allocation4 + $0x84] sm:$0xf0]  ;;  %v580_v29 = vld [vmem:[#allocation4 + $0x84] sm:$0xf]  ;;  %v504_v31 = vld [vmem:[#allocation4 + $0x88] sm:$0xf0] }
  0x24   :  { %365 = vmatpush.bf16.msra.mxu3 %v527_v58  ;;  %v503_v30 = vor.u32 %v581_v28, %v502_v27  ;;  %v507_v32 = vor.u32 %v580_v29, %v504_v31  ;;  %v438_v33 = vld [vmem:[#allocation4] sm:$0xf]  ;;  %v565_v34 = vld [vmem:[#allocation4 + $0x4] sm:$0xf0]  ;;  %v564_v35 = vld [vmem:[#allocation4 + $0x4] sm:$0xf] }
  0x25   :  { %393 = vmatpush.bf16.msrb.mxu0 %v531_v60  ;;  %351 = vmatpush.bf16.msra.mxu2 %v463_v0  ;;  %v439_v36 = vor.u32 %v565_v34, %v438_v33  ;;  %v440_v37 = vld [vmem:[#allocation4 + $0x8] sm:$0xf0]  ;;  %v68_v41 = vld [vmem:[#allocation6] sm:$0xff] }
  0x26   :  { %379 = vmatpush.bf16.msrb.mxu1 %v467_v2  ;;  %v443_v38 = vor.u32 %v564_v35, %v440_v37  ;;  %v69_v39 = vld [vmem:[#allocation6 + $0x8] sm:$0xff]  ;;  %v141_v44 = vperm.slane %v68_v41, 0  ;;  %v185_v61 = vperm.slane %v68_v41, 1  ;;  %v407_v7 = vperm.slane %v68_v41, 2 }
  0x27   :  { %v142_v43 = vperm.slane %v69_v39, 0  ;;  %v186_v57 = vperm.slane %v69_v39, 1  ;;  %v408_v3 = vperm.slane %v69_v39, 2  ;;  %v419_v23 = vperm.slane %v68_v41, 3 }
  0x28   :  { %366 = vmatpush.bf16.msra.mxu3 %v519_v5 }
  0x29   :  { %394 = vmatpush.bf16.msrb.mxu0 %v523_v8  ;;  %352 = vmatpush.bf16.msra.mxu2 %v455_v12 }
  0x2a   :  { %380 = vmatpush.bf16.msrb.mxu1 %v459_v14 }
  0x2c   :  { %367 = vmatpush.bf16.msra.mxu3 %v511_v18 }
  0x2d   :  { %395 = vmatpush.bf16.msrb.mxu0 %v515_v20  ;;  %353 = vmatpush.bf16.msra.mxu2 %v447_v24 }
  0x2e   :  { %381 = vmatpush.bf16.msrb.mxu1 %v451_v26 }
  0x30   :  { %368 = vmatpush.bf16.msra.mxu3 %v503_v30 }
  0x31   :  { %396 = vmatpush.bf16.msrb.mxu0 %v507_v32  ;;  %354 = vmatpush.bf16.msra.mxu2 %v439_v36 }
  0x32   :  { %382 = vmatpush.bf16.msrb.mxu1 %v443_v38 }
  0x8d   :  { %v135_v40 = vpop.f32.mrf.mxu1 }
  0x8e   :  { %v100_v42 = vpop.f32.mrf.mxu0  ;;  %v144_v45 = vadd.f32 %v142_v43, %v135_v40 }
  0x8f   :  { %v143_v47 = vadd.f32 %v141_v44, %v100_v42 }
  0x90   :  { %v148_v50 = vmax.f32 %v144_v45, 0.0 }
  0x91   :  { %v147_v53 = vmax.f32 %v143_v47, 0.0 }
  0x95   :  { %v138_v46 = vpop.f32.mrf.mxu1 }
  0x96   :  { %v146_v48 = vadd.f32 %v142_v43, %v138_v46 }
  0x97   :  { %v103_v49 = vpop.f32.mrf.mxu0 }
  0x98   :  { %v150_v51 = vmax.f32 %v146_v48, 0.0  ;;  %v145_v52 = vadd.f32 %v141_v44, %v103_v49 }
  0x9a   :  { %v149_v54 = vmax.f32 %v145_v52, 0.0  ;;  %v152_v55 = vpack.c.bf16 %v150_v51, %v148_v50 }
  0x9c   :  { %369 = vmatmul.bf16.vlgmr.msra.gmra.mxu3 %v152_v55  ;;  %397 = vmatmul.bf16.vlgmr.msrb.gmra.mxu0 %v152_v55  ;;  %v151_v56 = vpack.c.bf16 %v149_v54, %v147_v53 }
  0x9e   :  { %355 = vmatmul.bf16.vlgmr.msra.gmra.mxu2 %v151_v56  ;;  %383 = vmatmul.bf16.vlgmr.msrb.gmra.mxu1 %v151_v56 }
 0x119   :  { %v398_v60 = vpop.f32.mrf.mxu0 }
 0x11b   :  { %v384_v58 = vpop.f32.mrf.mxu1 }
 0x11c   :  { %v385_v59 = vadd.f32 %v384_v58, %v186_v57 }
 0x11e   :  { %v399_v62 = vadd.f32 %v398_v60, %v385_v59 }
 0x11f   :  { %v370_v63 = vpop.f32.mrf.mxu3 }
 0x120   :  { %v404_v4 = vmax.f32 %v399_v62, 0.0 }
 0x121   :  { %v356_v0 = vpop.f32.mrf.mxu2  ;;  %v400_v9 = vpop.f32.mrf.mxu0 }
 0x122   :  { %v357_v1 = vadd.f32 %v356_v0, %v185_v61  ;;  %v410_v12 = vmul.f32 %v408_v3, %v404_v4 }
 0x123   :  { %v386_v2 = vpop.f32.mrf.mxu1 }
 0x124   :  { %v371_v5 = vadd.f32 %v370_v63, %v357_v1  ;;  %v387_v6 = vadd.f32 %v386_v2, %v186_v57 }
 0x126   :  { %v403_v8 = vmax.f32 %v371_v5, 0.0  ;;  %v401_v10 = vadd.f32 %v400_v9, %v387_v6 }
 0x127   :  { %v372_v16 = vpop.f32.mrf.mxu3 }
 0x128   :  { %v409_v11 = vmul.f32 %v407_v7, %v403_v8  ;;  %v406_v17 = vmax.f32 %v401_v10, 0.0 }
 0x129   :  { %v358_v13 = vpop.f32.mrf.mxu2 }
 0x12a   :  { %v359_v14 = vadd.f32 %v358_v13, %v185_v61  ;;  %v413_v15 = vadd.f32 %v410_v12, %v409_v11  ;;  %v412_v21 = vmul.f32 %v408_v3, %v406_v17 }
 0x12c   :  { %v373_v18 = vadd.f32 %v372_v16, %v359_v14  ;;  %414 = vadd.xlane.f32.xlu0 %v413_v15 }
 0x12e   :  { %v405_v19 = vmax.f32 %v373_v18, 0.0 }
 0x130   :  { %v411_v20 = vmul.f32 %v407_v7, %v405_v19 }
 0x132   :  { %v416_v22 = vadd.f32 %v412_v21, %v411_v20 }
 0x134   :  { %417 = vadd.xlane.f32.xlu0 %v416_v22 }
 0x19f   :  { %v415_v24 = vpop.xlane.xlu0 %414 }
 0x1a0   :  { %v420_v25 = vadd.f32 %v419_v23, %v415_v24 }
 0x1a2   :  { %423 = vst.msk [vmem:[%s757_s6] sm:$0xff] %vm422_vm3, %v420_v25 }
 0x1a7   :  { %v418_v26 = vpop.xlane.xlu0 %417 }
 0x1a8   :  { %v421_v27 = vadd.f32 %v419_v23, %v418_v26 }
 0x1aa   :  { %424 = vst.msk [vmem:[%s757_s6 + $0x8] sm:$0xff] %vm422_vm3, %v421_v27 }
 0x1ab   :  { %429 = vsyncpa [#allocation3], 1 }
 0x1ac   :  { %430 = vsyncpa [#allocation5], 1 }

</bundles_post_ra>
